<compile_context>
chip_gen: v7x
topology: tpu7x:2x2x1
jax: 0.10.0
libtpu: 0.0.40
codegen_flags: <defaults>
</compile_context>

<pallas_src>
import functools

import jax
import jax.numpy as jnp
from jax.experimental import pallas as pl
from jax.experimental.pallas import tpu as pltpu


def _dropout_tensor_kernel(mask_ref, x_ref, o_ref):
    """One grid step: y_tile = x_tile * mask (mask broadcast over rows)."""
    o_ref[...] = x_ref[...] * mask_ref[...]


def _round_up(v, m):
    return ((v + m - 1) // m) * m


def _pick_row_tile(m, d, dtype_bytes, block_rows):
    """Largest row tile that keeps each pipelined buffer around ~2 MiB."""
    if block_rows is not None:
        return block_rows
    # sublane packing granularity: 8 for f32, 16 for bf16, 32 for int8/fp8
    row_align = max(8, 32 // max(dtype_bytes, 1))
    target_buf_bytes = 2 * 1024 * 1024  # 2 MiB/buffer -> ~8 MiB pipelined total
    rows = max(row_align, (target_buf_bytes // max(d * dtype_bytes, 1)))
    rows = (rows // row_align) * row_align
    rows = max(rows, row_align)
    # never tile bigger than the (aligned) problem itself
    rows = min(rows, _round_up(m, row_align))
    return rows


def dropout_tensor(x, ones, *, p, key=None, seed=0, training=True,
                   block_rows=None):
    """JAX/Pallas equivalent of DropoutTensor.forward(x).

    x    : (..., d) array (feature dim last)
    ones : (d,) buffer (registered all-ones buffer in the PyTorch module)
    """
    # PyTorch: p == 0 returns x unchanged; eval mode makes F.dropout identity.
    if p <= 0.0 or not training:
        return x
    if p >= 1.0:
        # F.dropout with p=1 zeroes everything (guard against 1/(1-p) blowup).
        return jnp.zeros_like(x)

    orig_shape = x.shape
    d = orig_shape[-1]
    dtype = x.dtype
    dtype_bytes = jnp.dtype(dtype).itemsize

    # ---- per-feature mask, computed once outside the kernel (tiny (d,) op) ----
    if key is None:
        key = jax.random.PRNGKey(seed)
    keep = jax.random.uniform(key, (d,), dtype=jnp.float32) >= jnp.float32(p)
    scale = jnp.float32(1.0 / (1.0 - p))
    mask = jnp.where(keep, scale, jnp.float32(0.0))
    mask = mask * ones.astype(jnp.float32)       # faithful to the `ones` buffer
    mask2 = mask.astype(dtype).reshape(1, d)     # multiply in x.dtype

    # ---- tile rows so each pipelined buffer is a few MiB ----
    x2 = x.reshape(-1, d)
    m = x2.shape[0]
    tm = _pick_row_tile(m, d, dtype_bytes, block_rows)
    m_pad = _round_up(m, tm)
    if m_pad != m:
        x2 = jnp.pad(x2, ((0, m_pad - m), (0, 0)))
    grid = (m_pad // tm,)

    # TODO(synk): for d not a multiple of 128 the output stores become masked
    # (vst.msk); fold several rows into the lane axis in the wrapper if that
    # shows up as a bottleneck.
    out = pl.pallas_call(
        _dropout_tensor_kernel,
        out_shape=jax.ShapeDtypeStruct((m_pad, d), dtype),
        grid=grid,
        in_specs=[
            pl.BlockSpec((1, d), lambda i: (0, 0)),    # precomputed mask
            pl.BlockSpec((tm, d), lambda i: (i, 0)),   # x row tile
        ],
        out_specs=pl.BlockSpec((tm, d), lambda i: (i, 0)),
        compiler_params=pltpu.CompilerParams(
            dimension_semantics=("parallel",)),
    )(mask2, x2)

    if m_pad != m:
        out = out[:m]
    return out.reshape(orig_shape)


if __name__ == "__main__":
    key = jax.random.PRNGKey(0)
    batch, seq, d = 2, 8, 128
    p = 0.25

    kx, kmask = jax.random.split(key)
    x = jax.random.normal(kx, (batch, seq, d), dtype=jnp.float32)
    # Deterministic buffer init (module registers ones(d)):
    ones = jnp.ones((d,), dtype=jnp.float32)

    # training-mode forward
    y = dropout_tensor(x, ones, p=p, key=kmask, training=True)
    y = jax.block_until_ready(y)

    # sanity: every feature column is either all-zero (dropped) or x/(1-p) (kept)
    y2 = y.reshape(-1, d)
    x2 = x.reshape(-1, d)
    scale = 1.0 / (1.0 - p)
    col_zero = jnp.all(jnp.abs(y2) < 1e-6, axis=0)
    col_kept = jnp.all(jnp.abs(y2 - x2 * scale) < 1e-4, axis=0)
    assert bool(jnp.all(col_zero | col_kept)), "dropout mask semantics violated"
    assert bool(jnp.any(col_zero)) and bool(jnp.any(col_kept)), \
        "expected a mix of kept and dropped features at p=0.25"

    # eval-mode / p == 0 paths are identities (no kernel launch, as in PyTorch)
    y_eval = dropout_tensor(x, ones, p=p, key=kmask, training=False)
    assert bool(jnp.all(y_eval == x))
    y_p0 = dropout_tensor(x, ones, p=0.0, key=kmask, training=True)
    assert bool(jnp.all(y_p0 == x))

    # non-divisible row count exercises the padding path
    x_odd = jax.random.normal(kx, (3, 5, d), dtype=jnp.float32)
    y_odd = jax.block_until_ready(
        dropout_tensor(x_odd, ones, p=p, key=kmask, training=True, block_rows=8))
    assert y_odd.shape == x_odd.shape

    print("KERNEL_OK")
</pallas_src>

<mosaic_0001>
module attributes {stable_mosaic.version = 11 : i64} {
  func.func @_dropout_tensor_kernel(%arg0: i32, %arg1: memref<1x128xf32, #tpu.memory_space<vmem>>, %arg2: memref<16x128xf32, #tpu.memory_space<vmem>>, %arg3: memref<16x128xf32, #tpu.memory_space<vmem>>) attributes {dimension_semantics = [#tpu.dimension_semantics<parallel>], iteration_bounds = array<i64: 1>, scalar_prefetch = 0 : i64, scratch_operands = 0 : i64, tpu.core_type = #tpu.core_type<tc>, window_params = [{pipeline_mode = #tpu.pipeline_mode<synchronous>, transform_indices = @transform_0, window_bounds = array<i64: 1, 128>}, {transform_indices = @transform_1, window_bounds = array<i64: 16, 128>}, {transform_indices = @transform_2, window_bounds = array<i64: 16, 128>}]} {
    %c0 = arith.constant 0 : index
    %c0_0 = arith.constant 0 : index
    %0 = vector.load %arg2[%c0, %c0_0] : memref<16x128xf32, #tpu.memory_space<vmem>>, vector<16x128xf32>
    %c0_1 = arith.constant 0 : index
    %c0_2 = arith.constant 0 : index
    %1 = vector.load %arg1[%c0_1, %c0_2] : memref<1x128xf32, #tpu.memory_space<vmem>>, vector<1x128xf32>
    %2 = vector.broadcast %1 : vector<1x128xf32> to vector<16x128xf32>
    %3 = arith.mulf %0, %2 : vector<16x128xf32>
    %c0_3 = arith.constant 0 : index
    %c0_4 = arith.constant 0 : index
    %4 = vector.load %arg3[%c0_3, %c0_4] : memref<16x128xf32, #tpu.memory_space<vmem>>, vector<16x128xf32>
    tpu.vector_store %arg3[%c0_3, %c0_4], %3 {strides = array<i32>} : memref<16x128xf32, #tpu.memory_space<vmem>>, vector<16x128xf32>,
    return
  }
  func.func @transform_0(%arg0: i32) -> (i32, i32) {
    %c0_i32 = arith.constant 0 : i32
    %c0_i32_0 = arith.constant 0 : i32
    %c0_i32_1 = arith.constant 0 : i32
    return %c0_i32, %c0_i32_0 : i32, i32
  }
  func.func @transform_1(%arg0: i32) -> (i32, i32) {
    %c0_i32 = arith.constant 0 : i32
    %c0_i32_0 = arith.constant 0 : i32
    return %arg0, %c0_i32 : i32, i32
  }
  func.func @transform_2(%arg0: i32) -> (i32, i32) {
    %c0_i32 = arith.constant 0 : i32
    %c0_i32_0 = arith.constant 0 : i32
    return %arg0, %c0_i32 : i32, i32
  }
}

</mosaic_0001>

<bundles_post_ra>
// kernel: tpu_custom_call.1
= control target key start
LH: loop header
LB: loop body
LE: loop exit
PB: predicated region body
PF: predicated region fallthrough
CT: control target
= control target key end

     0   :  { %7 = vsyncpa [#allocation3], 0  ;;  %s216_s0 = inlined_call_operand.hbm [shape: f32[1,128], index: 0, kind: input, shape index: {}]   ;;  %s217_s1 = inlined_call_operand.hbm [shape: f32[16,128], index: 1, kind: input, shape index: {}]   ;;  %s218_s2 = inlined_call_operand.hbm [shape: f32[16,128], index: 2, kind: output, shape index: {}]  }
   0x1   :  { %8 = vsyncpa [#allocation6], 0 }
   0x2   :  { %9 = vsyncpa [#allocation4], 0  ;;  %s147_s9 = smov [#allocation2]   ;;  %s148_s11 = smov [#allocation5]  }
   0x3   :  { %s16_s10 = sshll.u32 %s147_s9, 4  ;;  %s25_s12 = sshll.u32 %s148_s11, 4  ;;  %s17_s10 = int_to_ptr.vmem [resolvable:$true] %s16_s10  ;;  %s167_s12 = int_to_ptr.vmem [resolvable:$true] %s25_s12 }
   0x4   :  { %s75_s15 = scalar_lea.hbm %s216_s0, 16 }
   0x5   :  { %p76_p0 = scmp.ne.s32.totalorder %s216_s0, %s75_s15  ;;  %p79_p1 = scmp.lt.u32.totalorder %s75_s15, %s216_s0 }
   0x7   :  { %p81_p2 = pnand %p79_p1, %p76_p0 }
   0x9   :  { %84 = shalt.err (!%p81_p2)
}
   0xa   :  { %s85_s20 = scalar_lea.vmem %s17_s10, 16  ;;  %s89_s21 = scalar_lea.vmem %s17_s10, 32 }
   0xb   :  { %p86_p3 = scmp.ne.s32.totalorder %s17_s10, %s85_s20  ;;  %p90_p4 = scmp.lt.s32.totalorder %s17_s10, %s17_s10 }
   0xc   :  { %p91_p5 = scmp.lt.s32.totalorder %s89_s21, %s85_s20 }
   0xe   :  { %p92_p6 = por %p91_p5, %p90_p4 }
  0x10   :  { %p93_p7 = pnand %p92_p6, %p86_p3 }
  0x12   :  { %96 = shalt.err (!%p93_p7)
}
  0x13   :  { %19 = dma.hbm_to_vmem [thread:$0]  %s216_s0, 16, %s17_s10, [#allocation3]  }
  0x14   :  { %s97_s26 = scalar_lea.hbm %s217_s1, 256 }
  0x15   :  { %p98_p8 = scmp.ne.s32.totalorder %s217_s1, %s97_s26  ;;  %p101_p9 = scmp.lt.u32.totalorder %s97_s26, %s217_s1 }
  0x17   :  { %p103_p10 = pnand %p101_p9, %p98_p8 }
  0x19   :  { %106 = shalt.err (!%p103_p10)
}
  0x1a   :  { %s107_s3 = scalar_lea.vmem %s167_s12, 256  ;;  %p112_p12 = scmp.lt.s32.totalorder %s167_s12, %s167_s12 }
  0x1b   :  { %p108_p11 = scmp.ne.s32.totalorder %s167_s12, %s107_s3  ;;  %p113_p13 = scmp.lt.s32.totalorder %s107_s3, %s107_s3 }
  0x1d   :  { %p114_p0 = por %p113_p13, %p112_p12 }
  0x1f   :  { %p115_p1 = pnand %p114_p0, %p108_p11 }
  0x21   :  { %118 = shalt.err (!%p115_p1)
}
  0x22   :  { %s149_s0 = smov 128   ;;  %s150_s4 = smov 8  }
  0x23   :  { %31 = dma.hbm_to_vmem [thread:$0]  %s217_s1, 256, %s167_s12, [#allocation6], %s149_s0, %s149_s0, %s150_s4  }
  0x24   :  { %141 = dma.done.wait [#allocation3], 16  }
  0x25   :  { %142 = vsyncadd [#allocation3], 4294967280 }
  0x26   :  { %143 = dma.done.wait [#allocation6], 256  }
  0x27   :  { %144 = vsyncadd [#allocation6], 4294967040  ;;  %s151_s7 = smov [#allocation7]   ;;  %v38_v0 = vld [vmem:[#allocation5] sm:$0xff]  ;;  %v69_v1 = vld [vmem:[#allocation2] ss:$0 sm:$0xff] }
  0x28   :  { %s56_s8 = sshll.u32 %s151_s7, 4  ;;  %v39_v2 = vld [vmem:[#allocation5 + $0x8] sm:$0xff]  ;;  %v47_v3 = vmul.f32 %v69_v1, %v38_v0  ;;  %s57_s8 = int_to_ptr.vmem [resolvable:$true] %s56_s8 }
  0x29   :  { %v48_v4 = vmul.f32 %v69_v1, %v39_v2  ;;  %s119_s9 = scalar_lea.vmem %s57_s8, 256  ;;  %p124_p3 = scmp.lt.s32.totalorder %s57_s8, %s57_s8 }
  0x2a   :  { %49 = vst [vmem:[#allocation7] sm:$0xff] %v47_v3  ;;  %p120_p2 = scmp.ne.s32.totalorder %s57_s8, %s119_s9  ;;  %p125_p4 = scmp.lt.s32.totalorder %s119_s9, %s119_s9 }
  0x2b   :  { %50 = vst [vmem:[#allocation7 + $0x8] sm:$0xff] %v48_v4 }
  0x2c   :  { %p126_p5 = por %p125_p4, %p124_p3 }
  0x2e   :  { %p127_p6 = pnand %p126_p5, %p120_p2 }
  0x30   :  { %130 = shalt.err (!%p127_p6)
}
  0x31   :  { %s131_s11 = scalar_lea.hbm %s218_s2, 256 }
  0x32   :  { %p132_p7 = scmp.ne.s32.totalorder %s218_s2, %s131_s11  ;;  %p135_p8 = scmp.lt.u32.totalorder %s131_s11, %s218_s2 }
  0x34   :  { %p137_p9 = pnand %p135_p8, %p132_p7 }
  0x36   :  { %140 = shalt.err (!%p137_p9)
}
  0x37   :  { %62 = dma.vmem_to_hbm [thread:$0]  %s57_s8, 256, %s218_s2, [#allocation4], %s149_s0, %s149_s0, %s150_s4  }
  0x38   :  { %145 = dma.done.wait [#allocation4], 256  }
  0x39   :  { %146 = vsyncadd [#allocation4], 4294967040 }
  0x3a   :  { %66 = vsyncpa [#allocation3], 1 }
  0x3b   :  { %67 = vsyncpa [#allocation6], 1 }
  0x3c   :  { %68 = vsyncpa [#allocation4], 1 }

</bundles_post_ra>
